<compile_context>
chip_gen: v5e
topology: v5e:2x2
jax: 0.10.0
libtpu: 0.0.40
codegen_flags: <defaults>
</compile_context>

<pallas_src>
import numpy as np
import jax
import jax.numpy as jnp
from jax.experimental import pallas as pl
from jax.experimental.pallas import tpu as pltpu


_MAX_K_TILE = 2048  # 18 * 2048 * 4 B = 144 KiB per output block (double-buffered: ~288 KiB)


def _round_up(x, m):
    return ((x + m - 1) // m) * m


# ---------------- host-side static glue (pure function of shapes) -------------

def _build_tables(H, W, pyramid_levels, strides, row, line):
    """Build the per-column / per-row tables consumed by the fused kernel.

    Returns:
      tables: (3, Kpad) f32   rows = [cell-center x, cell-center y, anchor stride]
      rowp:   (2*A, 2)  f32   cols = [anchor coefficient, is_y flag], A = row*line
      ktot:   total feature-map cells across all levels
      k_tile: lane-tile size (multiple of 128)
    """
    shape = np.array([H, W])
    feat_shapes = [(shape + 2 ** p - 1) // (2 ** p) for p in pyramid_levels]

    sx_parts, sy_parts, st_parts = [], [], []
    for (fh, fw), p, s in zip(feat_shapes, pyramid_levels, strides):
        fh, fw = int(fh), int(fw)
        sx = (np.arange(fw, dtype=np.float64) + 0.5) * s     # shifts use self.strides
        sy = (np.arange(fh, dtype=np.float64) + 0.5) * s
        gx, gy = np.meshgrid(sx, sy)                          # (fh, fw), matches reference
        sx_parts.append(gx.ravel())
        sy_parts.append(gy.ravel())
        st_parts.append(np.full(fh * fw, float(2 ** p)))      # anchors use 2**level

    sx_all = np.concatenate(sx_parts)
    sy_all = np.concatenate(sy_parts)
    st_all = np.concatenate(st_parts)
    ktot = int(sx_all.shape[0])

    k_tile = _round_up(ktot, 128) if ktot <= _MAX_K_TILE else _MAX_K_TILE
    kpad = _round_up(ktot, k_tile)

    tables = np.zeros((3, kpad), dtype=np.float32)
    tables[0, :ktot] = sx_all.astype(np.float32)
    tables[1, :ktot] = sy_all.astype(np.float32)
    tables[2, :ktot] = st_all.astype(np.float32)

    A = row * line
    rowp = np.zeros((2 * A, 2), dtype=np.float32)
    for a in range(A):
        cx = (a % line + 0.5) * (1.0 / line) - 0.5   # anchor_x / stride
        cy = (a // line + 0.5) * (1.0 / row) - 0.5   # anchor_y / stride
        rowp[2 * a + 0] = (cx, 0.0)                  # x-coordinate row
        rowp[2 * a + 1] = (cy, 1.0)                  # y-coordinate row
    return tables, rowp, ktot, k_tile


# ---------------- Pallas kernel: fused, lane-dense anchor generation ----------

def _anchor_kernel(tab_ref, rowp_ref, out_ref):
    # tab_ref : (3, K_tile)    rows = [cell-center x; cell-center y; anchor stride]
    # rowp_ref: (2A, 2)        [:, 0] = anchor coefficient, [:, 1] = is_y (0./1.)
    # out_ref : (2A, K_tile)   out[2a+c, k] = shift_c[k] + stride[k] * coef[2a+c]
    sx = tab_ref[0:1, :]
    sy = tab_ref[1:2, :]
    st = tab_ref[2:3, :]
    coef = rowp_ref[:, 0:1]
    is_y = rowp_ref[:, 1:2]
    # Pure broadcast VPU arithmetic; full-lane stores on the K axis.
    out_ref[...] = sx + is_y * (sy - sx) + st * coef


def _fused_anchor_points(tables, rowp, ktot, A, k_tile):
    """Run the fused kernel and permute the lane-dense result to (ktot*A, 2)."""
    rows = 2 * A
    kpad = tables.shape[1]
    grid = (kpad // k_tile,)
    out = pl.pallas_call(
        _anchor_kernel,
        grid=grid,
        in_specs=[
            pl.BlockSpec((3, k_tile), lambda j: (0, j)),
            pl.BlockSpec((rows, 2), lambda j: (0, 0)),
        ],
        out_specs=pl.BlockSpec((rows, k_tile), lambda j: (0, j)),
        out_shape=jax.ShapeDtypeStruct((rows, kpad), jnp.float32),
        compiler_params=pltpu.CompilerParams(
            # TODO(synk): on v7x a CORE_PARALLEL axis would split tiles across the 2 TCs.
            dimension_semantics=("parallel",),
            vmem_limit_bytes=32 * 1024 * 1024,
        ),
    )(tables, rowp)
    # (2A, Kpad) -> (A, 2, Kpad) -> (Kpad, A, 2) -> (Kpad*A, 2).
    # Flat row = k*A + a, and per-level flat offsets equal A * column offsets,
    # so this is exactly the reference (per-level k-major, anchor-minor) order
    # for the whole concatenation; padded columns land past ktot*A and are cut.
    pts = jnp.transpose(out.reshape(A, 2, kpad), (2, 0, 1)).reshape(kpad * A, 2)
    return pts[: ktot * A]


# ---------------- module ------------------------------------------------------

class AnchorPoints:
    """JAX/Pallas port of gcp2pnet.models.p2pnet.AnchorPoints (no learned params)."""

    def __init__(self, pyramid_levels=None, strides=None, row=3, line=3):
        self.pyramid_levels = ([3, 4, 5, 6, 7] if pyramid_levels is None
                               else list(pyramid_levels))
        self.strides = ([2 ** x for x in self.pyramid_levels] if strides is None
                        else list(strides))
        self.row = int(row)
        self.line = int(line)
        self._cache = {}  # (H, W) -> device array; output depends only on shape.

    def __call__(self, image):
        # image: (N, C, H, W) -- only the spatial shape matters.
        H, W = int(image.shape[2]), int(image.shape[3])
        key = (H, W)
        cached = self._cache.get(key)
        if cached is None:
            cached = self._compute(H, W)
            self._cache[key] = cached
        # TODO(synk): torch.cuda.is_available() device branch has no JAX analogue;
        # the result lives on the default JAX (TPU) backend.
        return cached

    def _compute(self, H, W):
        tables_np, rowp_np, ktot, k_tile = _build_tables(
            H, W, self.pyramid_levels, self.strides, self.row, self.line)
        tables = jnp.asarray(tables_np)   # one small lane-dense H2D transfer
        rowp = jnp.asarray(rowp_np)
        A = self.row * self.line
        pts = _fused_anchor_points(tables, rowp, ktot, A, k_tile)
        return pts[None, :, :].astype(jnp.float32)   # (1, sum(K*A), 2)


# ---------------- reference (pure numpy, mirrors the PyTorch module) ----------

def _generate_anchor_points(stride, row=3, line=3):
    row_step = stride / row
    line_step = stride / line
    shift_x = (np.arange(1, line + 1) - 0.5) * line_step - stride / 2
    shift_y = (np.arange(1, row + 1) - 0.5) * row_step - stride / 2
    sx, sy = np.meshgrid(shift_x, shift_y)
    return np.vstack((sx.ravel(), sy.ravel())).transpose().astype(np.float32)  # (A, 2)


def _generate_shifts(fh, fw, stride):
    shift_x = (np.arange(0, fw) + 0.5) * stride
    shift_y = (np.arange(0, fh) + 0.5) * stride
    sx, sy = np.meshgrid(shift_x, shift_y)
    return np.vstack((sx.ravel(), sy.ravel())).transpose().astype(np.float32)  # (K, 2)


def _reference(image_shape_hw, pyramid_levels, row, line):
    image_shape = np.array(image_shape_hw)
    image_shapes = [(image_shape + 2 ** x - 1) // (2 ** x) for x in pyramid_levels]
    strides = [2 ** x for x in pyramid_levels]
    all_pts = np.zeros((0, 2), dtype=np.float32)
    for idx, p in enumerate(pyramid_levels):
        ap = _generate_anchor_points(2 ** p, row=row, line=line)
        fh, fw = image_shapes[idx]
        sh = _generate_shifts(int(fh), int(fw), strides[idx])
        A, K = ap.shape[0], sh.shape[0]
        out = (ap.reshape(1, A, 2) + sh.reshape(1, K, 2).transpose(1, 0, 2)).reshape(K * A, 2)
        all_pts = np.append(all_pts, out, axis=0)
    return np.expand_dims(all_pts, 0).astype(np.float32)


if __name__ == "__main__":
    key = jax.random.PRNGKey(0)
    x = jax.random.normal(key, (2, 4, 16, 16), dtype=jnp.float32)  # NCHW image

    model = AnchorPoints()  # pyramid_levels [3,4,5,6,7], row=3, line=3
    out = model(x)
    out = jax.block_until_ready(out)

    ref = _reference((16, 16), model.pyramid_levels, model.row, model.line)
    assert out.shape == ref.shape, (out.shape, ref.shape)
    assert np.allclose(np.asarray(out), ref, atol=1e-4), "mismatch vs numpy reference"

    # Second forward hits the per-shape cache (output is shape-static).
    out2 = jax.block_until_ready(model(x))
    assert out2 is out

    print("KERNEL_OK")
</pallas_src>

<mosaic_0001>
module attributes {stable_mosaic.version = 11 : i64} {
  func.func @_anchor_kernel(%arg0: i32, %arg1: memref<3x128xf32, #tpu.memory_space<vmem>>, %arg2: memref<18x2xf32, #tpu.memory_space<vmem>>, %arg3: memref<18x128xf32, #tpu.memory_space<vmem>>) attributes {dimension_semantics = [#tpu.dimension_semantics<parallel>], iteration_bounds = array<i64: 1>, scalar_prefetch = 0 : i64, scratch_operands = 0 : i64, tpu.core_type = #tpu.core_type<tc>, window_params = [{transform_indices = @transform_0, window_bounds = array<i64: 3, 128>}, {pipeline_mode = #tpu.pipeline_mode<synchronous>, transform_indices = @transform_1, window_bounds = array<i64: 18, 2>}, {transform_indices = @transform_2, window_bounds = array<i64: 18, 128>}]} {
    %c0 = arith.constant 0 : index
    %c0_0 = arith.constant 0 : index
    %0 = vector.load %arg1[%c0, %c0_0] : memref<3x128xf32, #tpu.memory_space<vmem>>, vector<1x128xf32>
    %c1 = arith.constant 1 : index
    %c0_1 = arith.constant 0 : index
    %1 = vector.load %arg1[%c1, %c0_1] : memref<3x128xf32, #tpu.memory_space<vmem>>, vector<1x128xf32>
    %c2 = arith.constant 2 : index
    %c0_2 = arith.constant 0 : index
    %2 = vector.load %arg1[%c2, %c0_2] : memref<3x128xf32, #tpu.memory_space<vmem>>, vector<1x128xf32>
    %c0_3 = arith.constant 0 : index
    %c0_4 = arith.constant 0 : index
    %3 = vector.load %arg2[%c0_3, %c0_4] : memref<18x2xf32, #tpu.memory_space<vmem>>, vector<18x1xf32>
    %c0_5 = arith.constant 0 : index
    %c1_6 = arith.constant 1 : index
    %4 = vector.load %arg2[%c0_5, %c1_6] : memref<18x2xf32, #tpu.memory_space<vmem>>, vector<18x1xf32>
    %5 = arith.subf %1, %0 : vector<1x128xf32>
    %6 = vector.broadcast %4 : vector<18x1xf32> to vector<18x128xf32>
    %7 = vector.broadcast %5 : vector<1x128xf32> to vector<18x128xf32>
    %8 = arith.mulf %6, %7 : vector<18x128xf32>
    %9 = vector.broadcast %0 : vector<1x128xf32> to vector<18x128xf32>
    %10 = arith.addf %9, %8 : vector<18x128xf32>
    %11 = vector.broadcast %2 : vector<1x128xf32> to vector<18x128xf32>
    %12 = vector.broadcast %3 : vector<18x1xf32> to vector<18x128xf32>
    %13 = arith.mulf %11, %12 : vector<18x128xf32>
    %14 = arith.addf %10, %13 : vector<18x128xf32>
    %c0_7 = arith.constant 0 : index
    %c0_8 = arith.constant 0 : index
    %15 = vector.load %arg3[%c0_7, %c0_8] : memref<18x128xf32, #tpu.memory_space<vmem>>, vector<18x128xf32>
    tpu.vector_store %arg3[%c0_7, %c0_8], %14 {strides = array<i32>} : memref<18x128xf32, #tpu.memory_space<vmem>>, vector<18x128xf32>,
    return
  }
  func.func @transform_0(%arg0: i32) -> (i32, i32) {
    %c0_i32 = arith.constant 0 : i32
    %c0_i32_0 = arith.constant 0 : i32
    return %c0_i32, %arg0 : i32, i32
  }
  func.func @transform_1(%arg0: i32) -> (i32, i32) {
    %c0_i32 = arith.constant 0 : i32
    %c0_i32_0 = arith.constant 0 : i32
    %c0_i32_1 = arith.constant 0 : i32
    return %c0_i32, %c0_i32_0 : i32, i32
  }
  func.func @transform_2(%arg0: i32) -> (i32, i32) {
    %c0_i32 = arith.constant 0 : i32
    %c0_i32_0 = arith.constant 0 : i32
    return %c0_i32, %arg0 : i32, i32
  }
}

</mosaic_0001>

<bundles_post_ra>
// kernel: tpu_custom_call.1
= control target key start
LH: loop header
LB: loop body
LE: loop exit
PB: predicated region body
PF: predicated region fallthrough
CT: control target
= control target key end

     0   :  { %v120_v2 = vmov 1   ;;  %s164_s0 = inlined_call_operand.vmem [shape: f32[3,128], index: 0, kind: input, shape index: {}]   ;;  %s165_s1 = inlined_call_operand.vmem [shape: f32[18,2], index: 1, kind: input, shape index: {}]   ;;  %s166_s2 = inlined_call_operand.hbm [shape: f32[18,128], index: 2, kind: output, shape index: {}]  }
   0x1   :  { %v17_v0 = vld [vmem:[%s165_s1 + $0x10] sm:$0x3]  ;;  %v15_v1 = vld [vmem:[%s165_s1] sm:$0xff]  ;;  %88 = vset.pattern.permute.xlu1 %v120_v2  ;;  %87 = vset.pattern.permute.xlu0 %v120_v2 }
   0x2   :  { %7 = vsyncpa [#allocation3], 0  ;;  %31 = vperm.xlu1 %88, %v17_v0   ;;  %21 = vperm.xlu0 %87, %v15_v1   ;;  %v16_v3 = vld [vmem:[%s165_s1 + $0x8] sm:$0xff]  ;;  %v121_v4 = vmov 0   ;;  %v12_v6 = vld [vmem:[%s164_s0] sm:$0x1] }
   0x3   :  { %90 = vset.pattern.permute.xlu2 %v121_v4  ;;  %v13_v7 = vld [vmem:[%s164_s0 + $0x1] sm:$0x1]  ;;  %v92_v9 = vld [vmem:[%s164_s0 + $0x2] ss:$0 sm:$0xff]  ;;  %v93_v12 = vld [vmem:[%s164_s0] ss:$0 sm:$0xff] }
   0x4   :  { %48 = vperm.xlu2 %90, %v16_v3   ;;  %v18_v8 = vsub.f32 %v13_v7, %v12_v6  ;;  %s122_s22 = smov [#allocation2]   ;;  %s70_s26 = sshll.u32 %s166_s2, 4  ;;  %s71_s26 = int_to_ptr.hbm [resolvable:$true] %s70_s26 }
   0x5   :  { %s68_s23 = sshll.u32 %s122_s22, 4  ;;  %s123_s0 = smov 128   ;;  %s69_s23 = int_to_ptr.vmem [resolvable:$true] %s68_s23 }
   0x6   :  { %v34_v10 = vperm.slane %v18_v8, 0  ;;  %s124_s27 = smov 8  }
   0xa   :  { %89 = vset.pattern.permute.xlu1 %v121_v4  ;;  %26 = vperm.xlu0 %87, %v16_v3  }
   0xb   :  { %44 = vperm.xlu1 %89, %v15_v1  }
   0xc   :  { %52 = vperm.xlu2 %90, %v17_v0  }
  0x12   :  { %91 = vset.pattern.permute.xlu0 %v121_v4 }
  0x5e   :  { %v49_v5 = vpop.permute.xlu2 %48 }
  0x5f   :  { %v56_v25 = vmul.f32 %v92_v9, %v49_v5 }
  0x66   :  { %v53_v11 = vpop.permute.xlu2 %52 }
  0x67   :  { %v57_v16 = vmul.f32 %v92_v9, %v53_v11 }
  0x74   :  { %v32_v13 = vpop.permute.xlu1 %31  ;;  %v22_v14 = vpop.permute.xlu0 %21 }
  0x75   :  { %v37_v15 = vmul.f32 %v34_v10, %v32_v13  ;;  %v35_v19 = vmul.f32 %v34_v10, %v22_v14 }
  0x77   :  { %v41_v17 = vadd.f32 %v93_v12, %v37_v15  ;;  %v39_v23 = vadd.f32 %v93_v12, %v35_v19 }
  0x79   :  { %v60_v18 = vadd.f32 %v57_v16, %v41_v17 }
  0x7b   :  { %63 = vst [vmem:[#allocation2 + $0x10] sm:$0x3] %v60_v18 }
  0x7c   :  { %v27_v20 = vpop.permute.xlu0 %26 }
  0x7d   :  { %v36_v21 = vmul.f32 %v34_v10, %v27_v20  ;;  %v45_v22 = vpop.permute.xlu1 %44 }
  0x7e   :  { %v55_v24 = vmul.f32 %v92_v9, %v45_v22 }
  0x7f   :  { %v40_v26 = vadd.f32 %v93_v12, %v36_v21 }
  0x80   :  { %v58_v27 = vadd.f32 %v55_v24, %v39_v23 }
  0x81   :  { %v59_v28 = vadd.f32 %v56_v25, %v40_v26 }
  0x82   :  { %61 = vst [vmem:[#allocation2] sm:$0xff] %v58_v27 }
  0x83   :  { %62 = vst [vmem:[#allocation2 + $0x8] sm:$0xff] %v59_v28 }
  0x84   :  { %76 = dma.vmem_to_hbm [thread:$0]  %s69_s23, 384, %s71_s26, [#allocation3], %s123_s0, %s123_s0, %s124_s27  }
  0x85   :  { %118 = dma.done.wait [#allocation3], 384  }
  0x86   :  { %119 = vsyncadd [#allocation3], 4294966912 }
  0x87   :  { %81 = vsyncpa [#allocation3], 1 }

</bundles_post_ra>
